<compile_context>
chip_gen: v5e
topology: v5e:2x2
jax: 0.10.0
libtpu: 0.0.40
codegen_flags: <defaults>
</compile_context>

<pallas_src>
import jax
import jax.numpy as jnp
from jax.experimental import pallas as pl
from jax.experimental.pallas import tpu as pltpu

# ----------------------- model hyper-parameters (small) -----------------------
B = 2            # batch
S = 8            # sequence length
H = 32           # hidden size
VOCAB = 30       # vocab size (synthetic)
VOCAB_PAD = 32   # padded token-embedding-table rows
SEG_PAD = 8      # padded segment-embedding-table rows
NUM_CASE = 3     # num_case
COREF = True     # coreference
C = NUM_CASE + int(COREF)      # effective number of cases = 4
CH = C * H                     # 128  -> exactly one vreg lane group
SCH = S * CH                   # 1024 -> 8 lane groups
CS = C * S                     # 32   -> output lanes per (b, p) row


# ------------------------------ fused Pallas kernel ----------------------------
def fused_forward_kernel(ids_ref, seg_ids_ref, tok_ref, sege_ref, pos_ref,
                         w_enc_ref, b_enc_ref, w_pa_ref, b_pa_ref, w2_ref,
                         att_ref, ng_ref, tgt_ref,
                         out_ref, loss_ref):
    """Whole forward in one grid-less kernel; everything lives in VMEM.

    ids_ref     : (B*S, 1)  int32   token ids
    seg_ids_ref : (B*S, 1)  int32   segment ids
    tok_ref     : (VOCAB_PAD, H) f32
    sege_ref    : (SEG_PAD, H)   f32
    pos_ref     : (S, H)         f32
    w_enc_ref   : (H, H)     bf16   encoder stand-in weight
    b_enc_ref   : (1, H)     f32
    w_pa_ref    : (H, 2*C*H) bf16   fused [l_prd | l_arg]
    b_pa_ref    : (1, 2*C*H) f32
    w2_ref      : (S*C*H, C*S) bf16 block-structured reducer built from w_out
    att_ref     : (B, S)     f32    attention mask {0,1}
    ng_ref      : (B*S, C*S) f32    ng_token_mask, natural (B,Sp,C,Sa) row-major
    tgt_ref     : (B*S, C*S) f32    target, natural (B,Sp,C,Sa) row-major
    out_ref     : (B*S, C*S) f32    scores in final (B,Sp,C,Sa) order (flattened)
    loss_ref    : (1, 1) SMEM f32   scalar loss
    """
    f32 = jnp.float32
    bf16 = jnp.bfloat16

    # (1) Embedding gather folded into the kernel as one-hot MXU matmuls
    #     (no separate XLA gather launch, no emb HBM round-trip).
    # TODO(synk): full MBartForConditionalGeneration encoder/decoder stack.
    ids = ids_ref[...]                                                  # (B*S, 1)
    seg = seg_ids_ref[...]                                              # (B*S, 1)
    tok_oh = (ids == jax.lax.broadcasted_iota(jnp.int32, (B * S, VOCAB_PAD), 1)
              ).astype(f32)                                             # (B*S, VOCAB_PAD)
    seg_oh = (seg == jax.lax.broadcasted_iota(jnp.int32, (B * S, SEG_PAD), 1)
              ).astype(f32)                                             # (B*S, SEG_PAD)
    emb = (jnp.dot(tok_oh, tok_ref[...], preferred_element_type=f32)
           + jnp.dot(seg_oh, sege_ref[...], preferred_element_type=f32)
           + jnp.concatenate([pos_ref[...]] * B, axis=0))               # (B*S, H) f32

    # (2) mBART decoder stand-in: one linear + tanh (MXU in bf16, tanh in f32).
    seq_out = jnp.tanh(
        jnp.dot(emb.astype(bf16), w_enc_ref[...], preferred_element_type=f32)
        + b_enc_ref[...])                                               # (B*S, H)

    # (3) Fused predicate/argument projection: single lane-dense matmul.
    hpa = (jnp.dot(seq_out.astype(bf16), w_pa_ref[...], preferred_element_type=f32)
           + b_pa_ref[...])                                             # (B*S, 2*CH)
    hp = hpa[:, :CH]                                                    # (B*S, 128) 128-aligned
    ha = hpa[:, CH:]                                                    # (B*S, 128) 128-aligned

    # (4) Lane-expanded pairwise operands, lane order (a, c, h):
    #     hp_t[bp, a*CH + j] = hp[bp, j]           (128-lane-aligned copies)
    #     ha_e[bp, a*CH + j] = ha[b*S + a, j]      (row slices + aligned lane concat)
    hp_t = jnp.concatenate([hp] * S, axis=1)                            # (B*S, S*CH)
    ha_rows = [
        jnp.concatenate([ha[b * S + a:b * S + a + 1, :] for a in range(S)], axis=1)
        for b in range(B)
    ]                                                                   # B x (1, S*CH)
    ha_b = jnp.concatenate(ha_rows, axis=0)                             # (B, S*CH)
    ha_e = jnp.broadcast_to(ha_b[:, None, :], (B, S, SCH)).reshape(B * S, SCH)

    # (5) Pairwise tanh on DENSE 128-lane vregs (single pass, no per-case loop).
    pa = jnp.tanh(hp_t + ha_e)                                          # (B*S, S*CH) f32

    # (6) Per-case weighted reduction + (Sa,C)->(C,Sa) reorder as ONE MXU matmul:
    #     scores[bp, c*S + a] = sum_h pa[bp, a*CH + c*H + h] * w_out[h]
    scores = jnp.dot(pa.astype(bf16), w2_ref[...],
                     preferred_element_type=f32)                        # (B*S, C*S)

    # (7) Penalty from attention_mask & ng_token_mask (masks are {0,1} f32).
    att = att_ref[...]                                                  # (B, S)
    att_t = jnp.concatenate([att] * C, axis=1)                          # (B, C*S)
    att_e = jnp.broadcast_to(att_t[:, None, :], (B, S, CS)).reshape(B * S, CS)
    ng = ng_ref[...]
    out = scores + (1.0 - att_e * ng) * (-1024.0)
    out_ref[...] = out                                                  # one dense store

    # (8) cross_entropy_pas_loss: log-softmax over Sa per (b, p, c) segment.
    tgt = tgt_ref[...]
    num = f32(0.0)
    for c in range(C):                         # tiny static tail on (B*S, S) slices
        o_c = out[:, c * S:(c + 1) * S]
        t_c = tgt[:, c * S:(c + 1) * S]
        m = jnp.max(o_c, axis=-1, keepdims=True)
        lse = m + jnp.log(jnp.sum(jnp.exp(o_c - m), axis=-1, keepdims=True))
        num = num + jnp.sum((lse - o_c) * t_c)
    loss_ref[0, 0] = num / (jnp.sum(tgt) + 1e-6)


# ------------------------------- parameter init --------------------------------
def init_params(key):
    ks = jax.random.split(key, 10)
    std = 0.02
    # l_prd: Linear(H, H*C), l_arg: Linear(H, H*C) — stored fused as [l_prd | l_arg]
    w_prd = jax.random.normal(ks[4], (H, H * C), jnp.float32) * std
    b_prd = jax.random.normal(ks[5], (H * C,), jnp.float32) * std
    w_arg = jax.random.normal(ks[6], (H, H * C), jnp.float32) * std
    b_arg = jax.random.normal(ks[7], (H * C,), jnp.float32) * std
    # out: Linear(H, 1, bias=False)
    w_out = jax.random.normal(ks[8], (H,), jnp.float32) * std

    # Block-structured reducer: w2[a*C*H + c*H + h, c*S + a] = w_out[h].
    # Folds out-projection + per-case reduction + (Sa,C)->(C,Sa) transpose into a
    # single in-kernel MXU matmul.  Built once at init (zero runtime cost).
    w2 = jnp.einsum('h,cd,ab->achdb', w_out,
                    jnp.eye(C, dtype=jnp.float32),
                    jnp.eye(S, dtype=jnp.float32)).reshape(S * C * H, C * S)

    tok = jnp.zeros((VOCAB_PAD, H), jnp.float32).at[:VOCAB].set(
        jax.random.normal(ks[0], (VOCAB, H), jnp.float32) * std)
    sege = jnp.zeros((SEG_PAD, H), jnp.float32).at[:2].set(
        jax.random.normal(ks[1], (2, H), jnp.float32) * std)

    return {
        # mBART stand-in (embeddings + one tanh projection "decoder")
        "tok_emb": tok,                                                     # (VOCAB_PAD, H) f32
        "seg_emb": sege,                                                    # (SEG_PAD, H)  f32
        "pos_emb": jax.random.normal(ks[2], (S, H), jnp.float32) * std,     # (S, H) f32
        "w_enc": (jax.random.normal(ks[3], (H, H), jnp.float32) * std).astype(jnp.bfloat16),
        "b_enc": jnp.zeros((1, H), jnp.float32),
        # fused [l_prd | l_arg]
        "w_pa": jnp.concatenate([w_prd, w_arg], axis=1).astype(jnp.bfloat16),   # (H, 2*C*H)
        "b_pa": jnp.concatenate([b_prd, b_arg], axis=0).reshape(1, 2 * C * H),  # (1, 2*C*H)
        # packed out-projection / reducer
        "w2": w2.astype(jnp.bfloat16),                                          # (S*C*H, C*S)
    }


# --------------------------------- forward ------------------------------------
def forward(params, input_ids, attention_mask, segment_ids, ng_token_mask, target):
    batch, seq = input_ids.shape

    # layout-only prep: metadata reshapes + tiny casts (fused by XLA)
    ids2d = input_ids.reshape(batch * seq, 1).astype(jnp.int32)
    seg2d = segment_ids.reshape(batch * seq, 1).astype(jnp.int32)
    att_f = attention_mask.astype(jnp.float32)                          # (B, S)
    ng2d = ng_token_mask.reshape(batch * seq, C * seq).astype(jnp.float32)
    tgt2d = target.reshape(batch * seq, C * seq).astype(jnp.float32)

    vmem = pl.BlockSpec(memory_space=pltpu.MemorySpace.VMEM)
    out2d, loss = pl.pallas_call(
        fused_forward_kernel,
        out_shape=(jax.ShapeDtypeStruct((batch * seq, C * seq), jnp.float32),
                   jax.ShapeDtypeStruct((1, 1), jnp.float32)),
        in_specs=[vmem] * 13,
        out_specs=(vmem,
                   pl.BlockSpec(memory_space=pltpu.MemorySpace.SMEM)),
    )(ids2d, seg2d,
      params["tok_emb"], params["seg_emb"], params["pos_emb"],
      params["w_enc"], params["b_enc"], params["w_pa"], params["b_pa"],
      params["w2"],
      att_f, ng2d, tgt2d)

    output = out2d.reshape(batch, seq, C, seq)     # metadata-only reshape
    return loss[0, 0], output


# ----------------------------------- main --------------------------------------
if __name__ == "__main__":
    key = jax.random.PRNGKey(0)
    k_param, k_ids, k_ng, k_tgt = jax.random.split(key, 4)

    params = init_params(k_param)

    input_ids = jax.random.randint(k_ids, (B, S), 1, VOCAB, dtype=jnp.int32)
    attention_mask = jnp.ones((B, S), jnp.int32).at[1, -2:].set(0)
    segment_ids = jnp.zeros((B, S), jnp.int32)
    ng_token_mask = jax.random.bernoulli(k_ng, 0.8, (B, S, C, S))
    target = jax.random.bernoulli(k_tgt, 0.2, (B, S, C, S)).astype(jnp.float32)

    loss, output = jax.jit(forward)(
        params, input_ids, attention_mask, segment_ids, ng_token_mask, target
    )
    jax.block_until_ready((loss, output))

    assert output.shape == (B, S, C, S)
    assert loss.shape == ()
    assert bool(jnp.isfinite(loss))
    print("KERNEL_OK")
</pallas_src>

<mosaic_0001>
module attributes {stable_mosaic.version = 11 : i64} {
  func.func @fused_forward_kernel(%arg0: memref<16x1xi32, #tpu.memory_space<vmem>>, %arg1: memref<16x1xi32, #tpu.memory_space<vmem>>, %arg2: memref<32x32xf32, #tpu.memory_space<vmem>>, %arg3: memref<8x32xf32, #tpu.memory_space<vmem>>, %arg4: memref<8x32xf32, #tpu.memory_space<vmem>>, %arg5: memref<32x32xbf16, #tpu.memory_space<vmem>>, %arg6: memref<1x32xf32, #tpu.memory_space<vmem>>, %arg7: memref<32x256xbf16, #tpu.memory_space<vmem>>, %arg8: memref<1x256xf32, #tpu.memory_space<vmem>>, %arg9: memref<1024x32xbf16, #tpu.memory_space<vmem>>, %arg10: memref<2x8xf32, #tpu.memory_space<vmem>>, %arg11: memref<16x32xf32, #tpu.memory_space<vmem>>, %arg12: memref<16x32xf32, #tpu.memory_space<vmem>>, %arg13: memref<16x32xf32, #tpu.memory_space<vmem>>, %arg14: memref<1x1xf32, #tpu.memory_space<smem>>) attributes {dimension_semantics = [], scalar_prefetch = 0 : i64, scratch_operands = 0 : i64, tpu.core_type = #tpu.core_type<tc>} {
    %c0 = arith.constant 0 : index
    %c0_0 = arith.constant 0 : index
    %0 = vector.load %arg0[%c0, %c0_0] : memref<16x1xi32, #tpu.memory_space<vmem>>, vector<16x1xi32>
    %c0_1 = arith.constant 0 : index
    %c0_2 = arith.constant 0 : index
    %1 = vector.load %arg1[%c0_1, %c0_2] : memref<16x1xi32, #tpu.memory_space<vmem>>, vector<16x1xi32>
    %2 = tpu.iota {dimensions = array<i32: 1>} : vector<16x32xi32>
    %3 = vector.broadcast %0 : vector<16x1xi32> to vector<16x32xi32>
    %4 = arith.cmpi eq, %3, %2 : vector<16x32xi32>
    %5 = arith.extui %4 : vector<16x32xi1> to vector<16x32xi32>
    %6 = arith.sitofp %5 : vector<16x32xi32> to vector<16x32xf32>
    %7 = tpu.iota {dimensions = array<i32: 1>} : vector<16x8xi32>
    %8 = vector.broadcast %1 : vector<16x1xi32> to vector<16x8xi32>
    %9 = arith.cmpi eq, %8, %7 : vector<16x8xi32>
    %10 = arith.extui %9 : vector<16x8xi1> to vector<16x8xi32>
    %11 = arith.sitofp %10 : vector<16x8xi32> to vector<16x8xf32>
    %c0_3 = arith.constant 0 : index
    %c0_4 = arith.constant 0 : index
    %12 = vector.load %arg2[%c0_3, %c0_4] : memref<32x32xf32, #tpu.memory_space<vmem>>, vector<32x32xf32>
    %cst = arith.constant dense<0.000000e+00> : vector<16x32xf32>
    %13 = tpu.matmul %6, %12, %cst {dimension_numbers = #tpu.dot_dimension_numbers<[1], [0], [0], [1], [0, 0, 1, 1], [], []>} : vector<16x32xf32>, vector<32x32xf32>, vector<16x32xf32> -> vector<16x32xf32>
    %c0_5 = arith.constant 0 : index
    %c0_6 = arith.constant 0 : index
    %14 = vector.load %arg3[%c0_5, %c0_6] : memref<8x32xf32, #tpu.memory_space<vmem>>, vector<8x32xf32>
    %cst_7 = arith.constant dense<0.000000e+00> : vector<16x32xf32>
    %15 = tpu.matmul %11, %14, %cst_7 {dimension_numbers = #tpu.dot_dimension_numbers<[1], [0], [0], [1], [0, 0, 1, 1], [], []>} : vector<16x8xf32>, vector<8x32xf32>, vector<16x32xf32> -> vector<16x32xf32>
    %16 = arith.addf %13, %15 : vector<16x32xf32>
    %c0_8 = arith.constant 0 : index
    %c0_9 = arith.constant 0 : index
    %17 = vector.load %arg4[%c0_8, %c0_9] : memref<8x32xf32, #tpu.memory_space<vmem>>, vector<8x32xf32>
    %18 = tpu.concatenate %17, %17 in 0 : vector<8x32xf32>, vector<8x32xf32> -> vector<16x32xf32>
    %19 = arith.addf %16, %18 : vector<16x32xf32>
    %20 = arith.truncf %19 : vector<16x32xf32> to vector<16x32xbf16>
    %c0_10 = arith.constant 0 : index
    %c0_11 = arith.constant 0 : index
    %21 = vector.load %arg5[%c0_10, %c0_11] : memref<32x32xbf16, #tpu.memory_space<vmem>>, vector<32x32xbf16>
    %cst_12 = arith.constant dense<0.000000e+00> : vector<16x32xf32>
    %22 = tpu.matmul %20, %21, %cst_12 {dimension_numbers = #tpu.dot_dimension_numbers<[1], [0], [0], [1], [0, 0, 1, 1], [], []>} : vector<16x32xbf16>, vector<32x32xbf16>, vector<16x32xf32> -> vector<16x32xf32>
    %c0_13 = arith.constant 0 : index
    %c0_14 = arith.constant 0 : index
    %23 = vector.load %arg6[%c0_13, %c0_14] : memref<1x32xf32, #tpu.memory_space<vmem>>, vector<1x32xf32>
    %24 = vector.broadcast %23 : vector<1x32xf32> to vector<16x32xf32>
    %25 = arith.addf %22, %24 : vector<16x32xf32>
    %26 = math.tanh %25 : vector<16x32xf32>
    %27 = arith.truncf %26 : vector<16x32xf32> to vector<16x32xbf16>
    %c0_15 = arith.constant 0 : index
    %c0_16 = arith.constant 0 : index
    %28 = vector.load %arg7[%c0_15, %c0_16] : memref<32x256xbf16, #tpu.memory_space<vmem>>, vector<32x256xbf16>
    %cst_17 = arith.constant dense<0.000000e+00> : vector<16x256xf32>
    %29 = tpu.matmul %27, %28, %cst_17 {dimension_numbers = #tpu.dot_dimension_numbers<[1], [0], [0], [1], [0, 0, 1, 1], [], []>} : vector<16x32xbf16>, vector<32x256xbf16>, vector<16x256xf32> -> vector<16x256xf32>
    %c0_18 = arith.constant 0 : index
    %c0_19 = arith.constant 0 : index
    %30 = vector.load %arg8[%c0_18, %c0_19] : memref<1x256xf32, #tpu.memory_space<vmem>>, vector<1x256xf32>
    %31 = vector.broadcast %30 : vector<1x256xf32> to vector<16x256xf32>
    %32 = arith.addf %29, %31 : vector<16x256xf32>
    %33 = vector.extract_strided_slice %32 {offsets = [0, 0], sizes = [16, 128], strides = [1, 1]} : vector<16x256xf32> to vector<16x128xf32>
    %34 = vector.extract_strided_slice %32 {offsets = [0, 128], sizes = [16, 128], strides = [1, 1]} : vector<16x256xf32> to vector<16x128xf32>
    %35 = tpu.concatenate %33, %33, %33, %33, %33, %33, %33, %33 in 1 : vector<16x128xf32>, vector<16x128xf32>, vector<16x128xf32>, vector<16x128xf32>, vector<16x128xf32>, vector<16x128xf32>, vector<16x128xf32>, vector<16x128xf32> -> vector<16x1024xf32>
    %36 = vector.extract_strided_slice %34 {offsets = [0, 0], sizes = [1, 128], strides = [1, 1]} : vector<16x128xf32> to vector<1x128xf32>
    %37 = vector.extract_strided_slice %34 {offsets = [1, 0], sizes = [1, 128], strides = [1, 1]} : vector<16x128xf32> to vector<1x128xf32>
    %38 = vector.extract_strided_slice %34 {offsets = [2, 0], sizes = [1, 128], strides = [1, 1]} : vector<16x128xf32> to vector<1x128xf32>
    %39 = vector.extract_strided_slice %34 {offsets = [3, 0], sizes = [1, 128], strides = [1, 1]} : vector<16x128xf32> to vector<1x128xf32>
    %40 = vector.extract_strided_slice %34 {offsets = [4, 0], sizes = [1, 128], strides = [1, 1]} : vector<16x128xf32> to vector<1x128xf32>
    %41 = vector.extract_strided_slice %34 {offsets = [5, 0], sizes = [1, 128], strides = [1, 1]} : vector<16x128xf32> to vector<1x128xf32>
    %42 = vector.extract_strided_slice %34 {offsets = [6, 0], sizes = [1, 128], strides = [1, 1]} : vector<16x128xf32> to vector<1x128xf32>
    %43 = vector.extract_strided_slice %34 {offsets = [7, 0], sizes = [1, 128], strides = [1, 1]} : vector<16x128xf32> to vector<1x128xf32>
    %44 = tpu.concatenate %36, %37, %38, %39, %40, %41, %42, %43 in 1 : vector<1x128xf32>, vector<1x128xf32>, vector<1x128xf32>, vector<1x128xf32>, vector<1x128xf32>, vector<1x128xf32>, vector<1x128xf32>, vector<1x128xf32> -> vector<1x1024xf32>
    %45 = vector.extract_strided_slice %34 {offsets = [8, 0], sizes = [1, 128], strides = [1, 1]} : vector<16x128xf32> to vector<1x128xf32>
    %46 = vector.extract_strided_slice %34 {offsets = [9, 0], sizes = [1, 128], strides = [1, 1]} : vector<16x128xf32> to vector<1x128xf32>
    %47 = vector.extract_strided_slice %34 {offsets = [10, 0], sizes = [1, 128], strides = [1, 1]} : vector<16x128xf32> to vector<1x128xf32>
    %48 = vector.extract_strided_slice %34 {offsets = [11, 0], sizes = [1, 128], strides = [1, 1]} : vector<16x128xf32> to vector<1x128xf32>
    %49 = vector.extract_strided_slice %34 {offsets = [12, 0], sizes = [1, 128], strides = [1, 1]} : vector<16x128xf32> to vector<1x128xf32>
    %50 = vector.extract_strided_slice %34 {offsets = [13, 0], sizes = [1, 128], strides = [1, 1]} : vector<16x128xf32> to vector<1x128xf32>
    %51 = vector.extract_strided_slice %34 {offsets = [14, 0], sizes = [1, 128], strides = [1, 1]} : vector<16x128xf32> to vector<1x128xf32>
    %52 = vector.extract_strided_slice %34 {offsets = [15, 0], sizes = [1, 128], strides = [1, 1]} : vector<16x128xf32> to vector<1x128xf32>
    %53 = tpu.concatenate %45, %46, %47, %48, %49, %50, %51, %52 in 1 : vector<1x128xf32>, vector<1x128xf32>, vector<1x128xf32>, vector<1x128xf32>, vector<1x128xf32>, vector<1x128xf32>, vector<1x128xf32>, vector<1x128xf32> -> vector<1x1024xf32>
    %54 = tpu.concatenate %44, %53 in 0 : vector<1x1024xf32>, vector<1x1024xf32> -> vector<2x1024xf32>
    %55 = vector.shape_cast %54 : vector<2x1024xf32> to vector<2x1x1024xf32>
    %56 = vector.shape_cast %55 : vector<2x1x1024xf32> to vector<2x1x1024xf32>
    %57 = vector.broadcast %56 : vector<2x1x1024xf32> to vector<2x8x1024xf32>
    %58 = vector.shape_cast %57 : vector<2x8x1024xf32> to vector<16x1024xf32>
    %59 = arith.addf %35, %58 : vector<16x1024xf32>
    %60 = math.tanh %59 : vector<16x1024xf32>
    %61 = arith.truncf %60 : vector<16x1024xf32> to vector<16x1024xbf16>
    %c0_20 = arith.constant 0 : index
    %c0_21 = arith.constant 0 : index
    %62 = vector.load %arg9[%c0_20, %c0_21] : memref<1024x32xbf16, #tpu.memory_space<vmem>>, vector<1024x32xbf16>
    %cst_22 = arith.constant dense<0.000000e+00> : vector<16x32xf32>
    %63 = tpu.matmul %61, %62, %cst_22 {dimension_numbers = #tpu.dot_dimension_numbers<[1], [0], [0], [1], [0, 0, 1, 1], [], []>} : vector<16x1024xbf16>, vector<1024x32xbf16>, vector<16x32xf32> -> vector<16x32xf32>
    %c0_23 = arith.constant 0 : index
    %c0_24 = arith.constant 0 : index
    %64 = vector.load %arg10[%c0_23, %c0_24] : memref<2x8xf32, #tpu.memory_space<vmem>>, vector<2x8xf32>
    %65 = tpu.concatenate %64, %64, %64, %64 in 1 : vector<2x8xf32>, vector<2x8xf32>, vector<2x8xf32>, vector<2x8xf32> -> vector<2x32xf32>
    %66 = vector.shape_cast %65 : vector<2x32xf32> to vector<2x1x32xf32>
    %67 = vector.shape_cast %66 : vector<2x1x32xf32> to vector<2x1x32xf32>
    %68 = vector.broadcast %67 : vector<2x1x32xf32> to vector<2x8x32xf32>
    %69 = vector.shape_cast %68 : vector<2x8x32xf32> to vector<16x32xf32>
    %c0_25 = arith.constant 0 : index
    %c0_26 = arith.constant 0 : index
    %70 = vector.load %arg11[%c0_25, %c0_26] : memref<16x32xf32, #tpu.memory_space<vmem>>, vector<16x32xf32>
    %71 = arith.mulf %69, %70 : vector<16x32xf32>
    %cst_27 = arith.constant 1.000000e+00 : f32
    %72 = vector.broadcast %cst_27 : f32 to vector<16x32xf32>
    %73 = arith.subf %72, %71 : vector<16x32xf32>
    %cst_28 = arith.constant -1.024000e+03 : f32
    %74 = vector.broadcast %cst_28 : f32 to vector<16x32xf32>
    %75 = arith.mulf %73, %74 : vector<16x32xf32>
    %76 = arith.addf %63, %75 : vector<16x32xf32>
    %c0_29 = arith.constant 0 : index
    %c0_30 = arith.constant 0 : index
    %77 = vector.load %arg13[%c0_29, %c0_30] : memref<16x32xf32, #tpu.memory_space<vmem>>, vector<16x32xf32>
    tpu.vector_store %arg13[%c0_29, %c0_30], %76 {strides = array<i32>} : memref<16x32xf32, #tpu.memory_space<vmem>>, vector<16x32xf32>,
    %c0_31 = arith.constant 0 : index
    %c0_32 = arith.constant 0 : index
    %78 = vector.load %arg12[%c0_31, %c0_32] : memref<16x32xf32, #tpu.memory_space<vmem>>, vector<16x32xf32>
    %79 = vector.extract_strided_slice %76 {offsets = [0, 0], sizes = [16, 8], strides = [1, 1]} : vector<16x32xf32> to vector<16x8xf32>
    %80 = vector.extract_strided_slice %78 {offsets = [0, 0], sizes = [16, 8], strides = [1, 1]} : vector<16x32xf32> to vector<16x8xf32>
    %cst_33 = arith.constant dense<0xFF800000> : vector<16xf32>
    %81 = vector.multi_reduction <maximumf>, %79, %cst_33 [1] : vector<16x8xf32> to vector<16xf32>
    %82 = vector.shape_cast %81 : vector<16xf32> to vector<16x1xf32>
    %83 = vector.broadcast %82 : vector<16x1xf32> to vector<16x8xf32>
    %84 = arith.subf %79, %83 : vector<16x8xf32>
    %85 = math.exp %84 : vector<16x8xf32>
    %cst_34 = arith.constant dense<0.000000e+00> : vector<16xf32>
    %86 = vector.multi_reduction <add>, %85, %cst_34 [1] : vector<16x8xf32> to vector<16xf32>
    %87 = vector.shape_cast %86 : vector<16xf32> to vector<16x1xf32>
    %88 = math.log %87 : vector<16x1xf32>
    %89 = arith.addf %82, %88 : vector<16x1xf32>
    %90 = vector.broadcast %89 : vector<16x1xf32> to vector<16x8xf32>
    %91 = arith.subf %90, %79 : vector<16x8xf32>
    %92 = arith.mulf %91, %80 : vector<16x8xf32>
    %93 = vector.shape_cast %92 : vector<16x8xf32> to vector<1x16x8xf32>
    %cst_35 = arith.constant dense<0.000000e+00> : vector<1xf32>
    %94 = vector.multi_reduction <add>, %93, %cst_35 [1, 2] : vector<1x16x8xf32> to vector<1xf32>
    %95 = vector.shape_cast %94 : vector<1xf32> to vector<1x1x1xf32>
    %96 = vector.extract %95[0, 0, 0] : f32 from vector<1x1x1xf32>
    %cst_36 = arith.constant 0.000000e+00 : f32
    %97 = arith.addf %cst_36, %96 : f32
    %98 = vector.extract_strided_slice %76 {offsets = [0, 8], sizes = [16, 8], strides = [1, 1]} : vector<16x32xf32> to vector<16x8xf32>
    %99 = vector.extract_strided_slice %78 {offsets = [0, 8], sizes = [16, 8], strides = [1, 1]} : vector<16x32xf32> to vector<16x8xf32>
    %cst_37 = arith.constant dense<0xFF800000> : vector<16xf32>
    %100 = vector.multi_reduction <maximumf>, %98, %cst_37 [1] : vector<16x8xf32> to vector<16xf32>
    %101 = vector.shape_cast %100 : vector<16xf32> to vector<16x1xf32>
    %102 = vector.broadcast %101 : vector<16x1xf32> to vector<16x8xf32>
    %103 = arith.subf %98, %102 : vector<16x8xf32>
    %104 = math.exp %103 : vector<16x8xf32>
    %cst_38 = arith.constant dense<0.000000e+00> : vector<16xf32>
    %105 = vector.multi_reduction <add>, %104, %cst_38 [1] : vector<16x8xf32> to vector<16xf32>
    %106 = vector.shape_cast %105 : vector<16xf32> to vector<16x1xf32>
    %107 = math.log %106 : vector<16x1xf32>
    %108 = arith.addf %101, %107 : vector<16x1xf32>
    %109 = vector.broadcast %108 : vector<16x1xf32> to vector<16x8xf32>
    %110 = arith.subf %109, %98 : vector<16x8xf32>
    %111 = arith.mulf %110, %99 : vector<16x8xf32>
    %112 = vector.shape_cast %111 : vector<16x8xf32> to vector<1x16x8xf32>
    %cst_39 = arith.constant dense<0.000000e+00> : vector<1xf32>
    %113 = vector.multi_reduction <add>, %112, %cst_39 [1, 2] : vector<1x16x8xf32> to vector<1xf32>
    %114 = vector.shape_cast %113 : vector<1xf32> to vector<1x1x1xf32>
    %115 = vector.extract %114[0, 0, 0] : f32 from vector<1x1x1xf32>
    %116 = arith.addf %97, %115 : f32
    %117 = vector.extract_strided_slice %76 {offsets = [0, 16], sizes = [16, 8], strides = [1, 1]} : vector<16x32xf32> to vector<16x8xf32>
    %118 = vector.extract_strided_slice %78 {offsets = [0, 16], sizes = [16, 8], strides = [1, 1]} : vector<16x32xf32> to vector<16x8xf32>
    %cst_40 = arith.constant dense<0xFF800000> : vector<16xf32>
    %119 = vector.multi_reduction <maximumf>, %117, %cst_40 [1] : vector<16x8xf32> to vector<16xf32>
    %120 = vector.shape_cast %119 : vector<16xf32> to vector<16x1xf32>
    %121 = vector.broadcast %120 : vector<16x1xf32> to vector<16x8xf32>
    %122 = arith.subf %117, %121 : vector<16x8xf32>
    %123 = math.exp %122 : vector<16x8xf32>
    %cst_41 = arith.constant dense<0.000000e+00> : vector<16xf32>
    %124 = vector.multi_reduction <add>, %123, %cst_41 [1] : vector<16x8xf32> to vector<16xf32>
    %125 = vector.shape_cast %124 : vector<16xf32> to vector<16x1xf32>
    %126 = math.log %125 : vector<16x1xf32>
    %127 = arith.addf %120, %126 : vector<16x1xf32>
    %128 = vector.broadcast %127 : vector<16x1xf32> to vector<16x8xf32>
    %129 = arith.subf %128, %117 : vector<16x8xf32>
    %130 = arith.mulf %129, %118 : vector<16x8xf32>
    %131 = vector.shape_cast %130 : vector<16x8xf32> to vector<1x16x8xf32>
    %cst_42 = arith.constant dense<0.000000e+00> : vector<1xf32>
    %132 = vector.multi_reduction <add>, %131, %cst_42 [1, 2] : vector<1x16x8xf32> to vector<1xf32>
    %133 = vector.shape_cast %132 : vector<1xf32> to vector<1x1x1xf32>
    %134 = vector.extract %133[0, 0, 0] : f32 from vector<1x1x1xf32>
    %135 = arith.addf %116, %134 : f32
    %136 = vector.extract_strided_slice %76 {offsets = [0, 24], sizes = [16, 8], strides = [1, 1]} : vector<16x32xf32> to vector<16x8xf32>
    %137 = vector.extract_strided_slice %78 {offsets = [0, 24], sizes = [16, 8], strides = [1, 1]} : vector<16x32xf32> to vector<16x8xf32>
    %cst_43 = arith.constant dense<0xFF800000> : vector<16xf32>
    %138 = vector.multi_reduction <maximumf>, %136, %cst_43 [1] : vector<16x8xf32> to vector<16xf32>
    %139 = vector.shape_cast %138 : vector<16xf32> to vector<16x1xf32>
    %140 = vector.broadcast %139 : vector<16x1xf32> to vector<16x8xf32>
    %141 = arith.subf %136, %140 : vector<16x8xf32>
    %142 = math.exp %141 : vector<16x8xf32>
    %cst_44 = arith.constant dense<0.000000e+00> : vector<16xf32>
    %143 = vector.multi_reduction <add>, %142, %cst_44 [1] : vector<16x8xf32> to vector<16xf32>
    %144 = vector.shape_cast %143 : vector<16xf32> to vector<16x1xf32>
    %145 = math.log %144 : vector<16x1xf32>
    %146 = arith.addf %139, %145 : vector<16x1xf32>
    %147 = vector.broadcast %146 : vector<16x1xf32> to vector<16x8xf32>
    %148 = arith.subf %147, %136 : vector<16x8xf32>
    %149 = arith.mulf %148, %137 : vector<16x8xf32>
    %150 = vector.shape_cast %149 : vector<16x8xf32> to vector<1x16x8xf32>
    %cst_45 = arith.constant dense<0.000000e+00> : vector<1xf32>
    %151 = vector.multi_reduction <add>, %150, %cst_45 [1, 2] : vector<1x16x8xf32> to vector<1xf32>
    %152 = vector.shape_cast %151 : vector<1xf32> to vector<1x1x1xf32>
    %153 = vector.extract %152[0, 0, 0] : f32 from vector<1x1x1xf32>
    %154 = arith.addf %135, %153 : f32
    %155 = vector.shape_cast %78 : vector<16x32xf32> to vector<1x16x32xf32>
    %cst_46 = arith.constant dense<0.000000e+00> : vector<1xf32>
    %156 = vector.multi_reduction <add>, %155, %cst_46 [1, 2] : vector<1x16x32xf32> to vector<1xf32>
    %157 = vector.shape_cast %156 : vector<1xf32> to vector<1x1x1xf32>
    %158 = vector.extract %157[0, 0, 0] : f32 from vector<1x1x1xf32>
    %cst_47 = arith.constant 9.99999997E-7 : f32
    %159 = arith.addf %158, %cst_47 : f32
    %160 = arith.divf %154, %159 : f32
    %c0_48 = arith.constant 0 : index
    %c0_49 = arith.constant 0 : index
    %161 = memref.load %arg14[%c0_48, %c0_49] : memref<1x1xf32, #tpu.memory_space<smem>>
    memref.store %160, %arg14[%c0_48, %c0_49] : memref<1x1xf32, #tpu.memory_space<smem>>
    return
  }
}

</mosaic_0001>

<bundles_post_ra>
// kernel: forward.1
= control target key start
LH: loop header
LB: loop body
LE: loop exit
PB: predicated region body
PF: predicated region fallthrough
CT: control target
= control target key end

     0   :  { %v1810_v2 = vmov 0   ;;  %s2367_s0 = inlined_call_operand.vmem [shape: s32[16,1], index: 0, kind: input, shape index: {}]   ;;  %s2368_s1 = inlined_call_operand.vmem [shape: s32[16,1], index: 1, kind: input, shape index: {}]   ;;  %s2369_s2 = inlined_call_operand.vmem [shape: f32[32,32], index: 2, kind: input, shape index: {}]   ;;  %s2370_s3 = inlined_call_operand.vmem [shape: f32[8,32], index: 3, kind: input, shape index: {}]   ;;  %s2371_s4 = inlined_call_operand.vmem [shape: f32[8,32], index: 4, kind: input, shape index: {}]   ;;  %s2372_s5 = inlined_call_operand.vmem [shape: bf16[32,32], index: 5, kind: input, shape index: {}]   ;;  %s2373_s6 = inlined_call_operand.vmem [shape: f32[1,32], index: 6, kind: input, shape index: {}]   ;;  %s2374_s7 = inlined_call_operand.vmem [shape: bf16[32,256], index: 7, kind: input, shape index: {}]   ;;  %s2375_s8 = inlined_call_operand.vmem [shape: f32[1,256], index: 8, kind: input, shape index: {}]   ;;  %s2376_s9 = inlined_call_operand.vmem [shape: bf16[1024,32], index: 9, kind: input, shape index: {}]   ;;  %s2377_s10 = inlined_call_operand.vmem [shape: f32[2,8], index: 10, kind: input, shape index: {}]   ;;  %s2378_s11 = inlined_call_operand.vmem [shape: f32[16,32], index: 11, kind: input, shape index: {}]   ;;  %s2379_s12 = inlined_call_operand.vmem [shape: f32[16,32], index: 12, kind: input, shape index: {}]   ;;  %s2380_s13 = inlined_call_operand.vmem [shape: f32[16,32], index: 13, kind: output, shape index: {0}]   ;;  %s2381_s14 = inlined_call_operand.hbm [shape: f32[1,1], index: 14, kind: output, shape index: {1}]  }
   0x1   :  { %v51_v0 = vld [vmem:[%s2368_s1 + $0x8] sm:$0xff]  ;;  %1724 = vset.pattern.permute.xlu1 %v1810_v2  ;;  %1723 = vset.pattern.permute.xlu0 %v1810_v2 }
   0x2   :  { %v49_v1 = vld [vmem:[%s2367_s0 + $0x8] sm:$0xff] }
   0x3   :  { %20 = vsyncpa [#allocation3], 0  ;;  %70 = vperm.xlu0 %1723, %v51_v0   ;;  %58 = vperm.xlu1 %1724, %v49_v1   ;;  %v50_v3 = vld [vmem:[%s2368_s1] sm:$0xff]  ;;  %v81_v6 = vld [vmem:[%s2369_s2 + $0x18] sm:$0xff]  ;;  %v52_v10 = vlaneseq  ;;  %vm83_vm0 = vcmask 64512   ;;  %v1811_v14 = vmov 0.0  }
   0x4   :  { %v48_v4 = vld [vmem:[%s2367_s0] sm:$0xff]  ;;  %v80_v7 = vld [vmem:[%s2369_s2 + $0x10] sm:$0xff]  ;;  %v79_v8 = vld [vmem:[%s2369_s2 + $0x8] sm:$0xff]  ;;  %vm113_vm2 = vcmask 261120   ;;  %vm286_vm6 = vcmask 1040384   ;;  %vm311_vm7 = vcmask 1042434  }
   0x5   :  { %v82_v5 = vld [vmem:[%s2370_s3] sm:$0xff]  ;;  %v53_v11 = vand.u32 127, %v52_v10  ;;  %v1632_v21 = vld [vmem:[%s2372_s5 + $0x8] sm:$0xff]  ;;  %v1635_v33 = vld [vmem:[%s2374_s7 + $0x14] sm:$0xf]  ;;  %vm313_vm8 = vcmask 1041408  }
   0x6   :  { %1701 = vmatpush.msra.mxu1 %v82_v5  ;;  %105 = vmatpush.msra.mxu0 %v82_v5  ;;  %v78_v9 = vld [vmem:[%s2369_s2] sm:$0xff]  ;;  %v1363_v34 = vld [vmem:[%s2374_s7 + $0x18] sm:$0xf0]  ;;  %v1361_v35 = vld [vmem:[%s2374_s7 + $0x10] sm:$0xf]  ;;  %vm315_vm9 = vcmask 1044484  }
   0x7   :  { %176 = vmatpush.bf16.msra.mxu2 %v1632_v21  ;;  %v1631_v22 = vld [vmem:[%s2372_s5] sm:$0xff]  ;;  %v1366_v36 = vor.u32 %v1635_v33, %v1363_v34  ;;  %v1636_v37 = vld [vmem:[%s2374_s7 + $0x14] sm:$0xf0]  ;;  %v1355_v39 = vld [vmem:[%s2374_s7 + $0x8] sm:$0xf0]  ;;  %vm317_vm10 = vcmask 1046534  }
   0x8   :  { %132 = vmatpush.msrb.mxu1 %v81_v6  ;;  %v143_v27 = vld [vmem:[%s2371_s4] sm:$0xff]  ;;  %v1362_v40 = vor.u32 %v1636_v37, %v1361_v35  ;;  %v1634_v42 = vld [vmem:[%s2374_s7 + $0x4] sm:$0xf0]  ;;  %v1644_v45 = vld [vmem:[%s2376_s9 + $0x38] sm:$0xff]  ;;  %vm323_vm11 = vcmask 1041409   ;;  %vm325_vm12 = vcmask 1043459  }
   0x9   :  { %v1633_v38 = vld [vmem:[%s2374_s7 + $0x4] sm:$0xf]  ;;  %v1353_v41 = vld [vmem:[%s2374_s7] sm:$0xf]  ;;  %240 = vmatpush.bf16.msrb.mxu0 %v1366_v36  ;;  %v1652_v46 = vld [vmem:[%s2376_s9 + $0x78] sm:$0xff]  ;;  %vm329_vm13 = vcmask 1045509  }
   0xa   :  { %133 = vmatpush.msrb.mxu1 %v80_v7  ;;  %v1358_v43 = vor.u32 %v1633_v38, %v1355_v39  ;;  %226 = vmatpush.bf16.msra.mxu3 %v1362_v40  ;;  %v1354_v44 = vor.u32 %v1634_v42, %v1353_v41  ;;  %v1660_v47 = vld [vmem:[%s2376_s9 + $0xb8] sm:$0xff]  ;;  %v1643_v49 = vld [vmem:[%s2376_s9 + $0x30] sm:$0xff]  ;;  %v1725_v54 = vld [vmem:[%s2373_s6] ss:$0 sm:$0xff]  ;;  %vm331_vm14 = vcmask 1046528   ;;  %vm319_vm15 = vcmask 1045508  }
   0xb   :  { %67 = vperm.xlu1 %1724, %v50_v3   ;;  %55 = vperm.xlu0 %1723, %v48_v4   ;;  %v1668_v48 = vld [vmem:[%s2376_s9 + $0xf8] sm:$0xff]  ;;  %v1651_v50 = vld [vmem:[%s2376_s9 + $0x70] sm:$0xff]  ;;  %v1642_v61 = vld [vmem:[%s2376_s9 + $0x28] sm:$0xff]  ;;  %s1812_s27 = smov 24   ;;  %s1813_s0 = smov 8  }
   0xc   :  { %134 = vmatpush.msrb.mxu1 %v79_v8  ;;  %177 = vmatpush.bf16.msra.mxu2 %v1631_v22  ;;  %v1659_v51 = vld [vmem:[%s2376_s9 + $0xb0] sm:$0xff]  ;;  %v1650_v62 = vld [vmem:[%s2376_s9 + $0x68] sm:$0xff]  ;;  %v1641_v1 = vld [vmem:[%s2376_s9 + $0x20] sm:$0xff]  ;;  %s1814_s4 = smov 16   ;;  %s1816_s1 = smov 120  }
   0xd   :  { %241 = vmatpush.bf16.msrb.mxu0 %v1358_v43  ;;  %v1667_v52 = vld [vmem:[%s2376_s9 + $0xf0] sm:$0xff]  ;;  %v1658_v63 = vld [vmem:[%s2376_s9 + $0xa8] sm:$0xff]  ;;  %v1649_v2 = vld [vmem:[%s2376_s9 + $0x60] sm:$0xff]  ;;  %s1322_s19 = sshll.u32 %s2381_s14, 4  ;;  %s1323_s19 = int_to_ptr.hbm [resolvable:$true] %s1322_s19 }
   0xe   :  { %135 = vmatpush.msrb.mxu1 %v78_v9  ;;  %227 = vmatpush.bf16.msra.mxu3 %v1354_v44  ;;  %v1666_v0 = vld [vmem:[%s2376_s9 + $0xe8] sm:$0xff]  ;;  %v1657_v3 = vld [vmem:[%s2376_s9 + $0xa0] sm:$0xff]  ;;  %v1640_v5 = vld [vmem:[%s2376_s9 + $0x18] sm:$0xff] }
   0xf   :  { %v1665_v4 = vld [vmem:[%s2376_s9 + $0xe0] sm:$0xff]  ;;  %v1648_v6 = vld [vmem:[%s2376_s9 + $0x58] sm:$0xff]  ;;  %v1639_v9 = vld [vmem:[%s2376_s9 + $0x10] sm:$0xff] }
  0x10   :  { %966 = vmatpush.bf16.msrb.mxu2 %v1652_v46  ;;  %v1656_v7 = vld [vmem:[%s2376_s9 + $0x98] sm:$0xff]  ;;  %v1647_v10 = vld [vmem:[%s2376_s9 + $0x50] sm:$0xff]  ;;  %v1698_v33 = vld [vmem:[%s2376_s9 + $0x1e8] sm:$0xff] }
  0x11   :  { %v1664_v8 = vld [vmem:[%s2376_s9 + $0xd8] sm:$0xff]  ;;  %v1673_v36 = vld [vmem:[%s2376_s9 + $0x120] sm:$0xff] }
  0x12   :  { %980 = vmatpush.bf16.msrb.mxu3 %v1660_v47  ;;  %v1676_v21 = vld [vmem:[%s2376_s9 + $0x138] sm:$0xff]  ;;  %v1681_v37 = vld [vmem:[%s2376_s9 + $0x160] sm:$0xff] }
  0x13   :  { %v1684_v22 = vld [vmem:[%s2376_s9 + $0x178] sm:$0xff]  ;;  %v1689_v38 = vld [vmem:[%s2376_s9 + $0x1a0] sm:$0xff] }
  0x14   :  { %967 = vmatpush.bf16.msrb.mxu2 %v1651_v50  ;;  %v1697_v39 = vld [vmem:[%s2376_s9 + $0x1e0] sm:$0xff]  ;;  %v1688_v50 = vld [vmem:[%s2376_s9 + $0x198] sm:$0xff] }
  0x16   :  { %981 = vmatpush.bf16.msrb.mxu3 %v1659_v51 }
  0x18   :  { %968 = vmatpush.bf16.msrb.mxu2 %v1650_v62 }
  0x1a   :  { %982 = vmatpush.bf16.msrb.mxu3 %v1658_v63 }
  0x1c   :  { %969 = vmatpush.bf16.msrb.mxu2 %v1649_v2  ;;  %v1687_v2 = vld [vmem:[%s2376_s9 + $0x190] sm:$0xff] }
  0x1e   :  { %983 = vmatpush.bf16.msrb.mxu3 %v1657_v3  ;;  %v1695_v3 = vld [vmem:[%s2376_s9 + $0x1d0] sm:$0xff] }
  0x20   :  { %970 = vmatpush.bf16.msrb.mxu2 %v1648_v6 }
  0x22   :  { %984 = vmatpush.bf16.msrb.mxu3 %v1656_v7 }
  0x24   :  { %971 = vmatpush.bf16.msrb.mxu2 %v1647_v10 }
  0x75   :  { %v71_v12 = vpop.permute.xlu0 %70  ;;  %v59_v13 = vpop.permute.xlu1 %58 }
  0x76   :  { %vm73_vm1 = vcmp.eq.s32.totalorder %v71_v12, %v53_v11  ;;  %vm61_vm5 = vcmp.eq.s32.totalorder %v59_v13, %v53_v11  ;;  %v1663_v12 = vld [vmem:[%s2376_s9 + $0xd0] sm:$0xff]  ;;  %v1638_v13 = vld [vmem:[%s2376_s9 + $0x8] sm:$0xff] }
  0x77   :  { %v1337_v15 = vsel %vm73_vm1, 1.0, %v1811_v14  ;;  %v1335_v20 = vsel %vm61_vm5, 1.0, %v1811_v14  ;;  %vm327_vm1 = vcmask 1042433   ;;  %vm321_vm5 = vcmask 1043456  }
  0x78   :  { %1339 = vmatmul.msk.f32.vlgmr.msra.gmra.mxu1 %vm83_vm0, %v1337_v15  ;;  %v1654_v15 = vld [vmem:[%s2376_s9 + $0x88] sm:$0xff] }
  0x79   :  { %952 = vmatpush.bf16.msra.mxu1 %v1644_v45 }
  0x7d   :  { %v68_v16 = vpop.permute.xlu1 %67  ;;  %v56_v17 = vpop.permute.xlu0 %55  ;;  %953 = vmatpush.bf16.msra.mxu1 %v1643_v49  ;;  %v1680_v49 = vld [vmem:[%s2376_s9 + $0x158] sm:$0xff] }
  0x7e   :  { %vm72_vm3 = vcmp.eq.s32.totalorder %v68_v16, %v53_v11  ;;  %vm60_vm4 = vcmp.eq.s32.totalorder %v56_v17, %v53_v11  ;;  %v1655_v11 = vld [vmem:[%s2376_s9 + $0x90] sm:$0xff]  ;;  %v1662_v16 = vld [vmem:[%s2376_s9 + $0xc8] sm:$0xff]  ;;  %v1637_v17 = vld [vmem:[%s2376_s9] sm:$0xff] }
  0x7f   :  { %v1336_v18 = vsel %vm72_vm3, 1.0, %v1811_v14  ;;  %v1334_v19 = vsel %vm60_vm4, 1.0, %v1811_v14  ;;  %985 = vmatpush.bf16.msrb.mxu3 %v1655_v11  ;;  %v1646_v14 = vld [vmem:[%s2376_s9 + $0x48] sm:$0xff]  ;;  %vm333_vm3 = vcmask 1046533   ;;  %vm335_vm4 = vcmask 1044481  }
  0x80   :  { %1338 = vmatmul.msk.f32.vlgmr.msra.gmra.mxu0 %vm83_vm0, %v1336_v18  ;;  %1340 = vmatmul.msk.f32.vlgmr.msrb.gmra.mxu1 %vm113_vm2, %v1334_v19  ;;  %v1645_v18 = vld [vmem:[%s2376_s9 + $0x40] sm:$0xff] }
  0x81   :  { %994 = vmatpush.bf16.msra.mxu0 %v1668_v48  ;;  %954 = vmatpush.bf16.msra.mxu1 %v1642_v61  ;;  %v1653_v19 = vld [vmem:[%s2376_s9 + $0x80] sm:$0xff]  ;;  %v1672_v48 = vld [vmem:[%s2376_s9 + $0x118] sm:$0xff]  ;;  %v1679_v61 = vld [vmem:[%s2376_s9 + $0x150] sm:$0xff] }
  0x82   :  { %972 = vmatpush.bf16.msrb.mxu2 %v1646_v14 }
  0x83   :  { %986 = vmatpush.bf16.msrb.mxu3 %v1654_v15 }
  0x85   :  { %995 = vmatpush.bf16.msra.mxu0 %v1667_v52  ;;  %955 = vmatpush.bf16.msra.mxu1 %v1641_v1 }
  0x86   :  { %973 = vmatpush.bf16.msrb.mxu2 %v1645_v18 }
  0x87   :  { %987 = vmatpush.bf16.msrb.mxu3 %v1653_v19 }
  0x88   :  { %1341 = vmatmul.msk.f32.gmra.mxu1 %vm113_vm2, %v1335_v20  ;;  %v1661_v20 = vld [vmem:[%s2376_s9 + $0xc0] sm:$0xff] }
  0x89   :  { %996 = vmatpush.bf16.msra.mxu0 %v1666_v0  ;;  %956 = vmatpush.bf16.msra.mxu1 %v1640_v5 }
  0x8d   :  { %997 = vmatpush.bf16.msra.mxu0 %v1665_v4  ;;  %957 = vmatpush.bf16.msra.mxu1 %v1639_v9 }
  0x91   :  { %998 = vmatpush.bf16.msra.mxu0 %v1664_v8  ;;  %958 = vmatpush.bf16.msra.mxu1 %v1638_v13 }
  0x95   :  { %999 = vmatpush.bf16.msra.mxu0 %v1663_v12  ;;  %959 = vmatpush.bf16.msra.mxu1 %v1637_v17  ;;  %v1678_v17 = vld [vmem:[%s2376_s9 + $0x148] sm:$0xff] }
  0x99   :  { %1000 = vmatpush.bf16.msra.mxu0 %v1662_v16  ;;  %1008 = vmatpush.bf16.msrb.mxu1 %v1676_v21  ;;  %v1670_v16 = vld [vmem:[%s2376_s9 + $0x108] sm:$0xff] }
  0x9a   :  { %v1686_v21 = vld [vmem:[%s2376_s9 + $0x188] sm:$0xff] }
  0x9d   :  { %1001 = vmatpush.bf16.msra.mxu0 %v1661_v20 }
  0xf5   :  { %v110_v23 = vpop.f32.mrf.mxu1 }
  0xfd   :  { %v137_v24 = vpop.f32.mrf.mxu1  ;;  %v107_v25 = vpop.f32.mrf.mxu0 }
  0xfe   :  { %v138_v26 = vadd.f32 %v137_v24, %v107_v25  ;;  %v1700_v24 = vld [vmem:[%s2376_s9 + $0x1f8] sm:$0xff]  ;;  %v1675_v25 = vld [vmem:[%s2376_s9 + $0x130] sm:$0xff] }
  0xff   :  { %1009 = vmatpush.bf16.msrb.mxu1 %v1675_v25 }
 0x100   :  { %v144_v30 = vadd.f32 %v143_v27, %v138_v26  ;;  %v1683_v26 = vld [vmem:[%s2376_s9 + $0x170] sm:$0xff] }
 0x105   :  { %v140_v28 = vpop.f32.mrf.mxu1 }
 0x106   :  { %v141_v29 = vadd.f32 %v140_v28, %v110_v23  ;;  %v1692_v23 = vld [vmem:[%s2376_s9 + $0x1b8] sm:$0xff]  ;;  %v1699_v28 = vld [vmem:[%s2376_s9 + $0x1f0] sm:$0xff] }
 0x108   :  { %v145_v31 = vadd.f32 %v143_v27, %v141_v29  ;;  %v1691_v27 = vld [vmem:[%s2376_s9 + $0x1b0] sm:$0xff]  ;;  %v1674_v29 = vld [vmem:[%s2376_s9 + $0x128] sm:$0xff] }
 0x109   :  { %1010 = vmatpush.bf16.msrb.mxu1 %v1674_v29 }
 0x10a   :  { %v146_v32 = vpack.c.bf16 %v145_v31, %v144_v30  ;;  %v1682_v30 = vld [vmem:[%s2376_s9 + $0x168] sm:$0xff]  ;;  %v2093_v31 = vld [vmem:[%s2375_s8] sm:$0x3] }
 0x10b   :  { %v194_v35 = vperm.slane %v2093_v31, 1  ;;  %v193_v41 = vperm.slane %v2093_v31, 0 }
 0x10c   :  { %1350 = vmatmul.msk.bf16.vlgmr.msra.gmra.mxu2 %vm113_vm2, %v146_v32  ;;  %v1690_v32 = vld [vmem:[%s2376_s9 + $0x1a8] sm:$0xff] }
 0x10d   :  { %1022 = vmatpush.bf16.msra.mxu2 %v1684_v22  ;;  %1011 = vmatpush.bf16.msrb.mxu1 %v1673_v36  ;;  %v1694_v22 = vld [vmem:[%s2376_s9 + $0x1c8] sm:$0xff]  ;;  %v1669_v36 = vld [vmem:[%s2376_s9 + $0x100] sm:$0xff] }
 0x111   :  { %1023 = vmatpush.bf16.msra.mxu2 %v1683_v26  ;;  %1012 = vmatpush.bf16.msrb.mxu1 %v1672_v48 }
 0x115   :  { %1024 = vmatpush.bf16.msra.mxu2 %v1682_v30 }
 0x119   :  { %1025 = vmatpush.bf16.msra.mxu2 %v1681_v37  ;;  %v1677_v37 = vld [vmem:[%s2376_s9 + $0x140] sm:$0xff] }
 0x11d   :  { %1026 = vmatpush.bf16.msra.mxu2 %v1680_v49 }
 0x121   :  { %1027 = vmatpush.bf16.msra.mxu2 %v1679_v61 }
 0x125   :  { %1028 = vmatpush.bf16.msra.mxu2 %v1678_v17 }
 0x129   :  { %1029 = vmatpush.bf16.msra.mxu2 %v1677_v37 }
 0x18f   :  { %v179_v53 = vpop.f32.mrf.mxu2 }
 0x190   :  { %v180_v55 = vadd.f32 %v1725_v54, %v179_v53 }
 0x192   :  { %1726 = vtanh.f32 %v180_v55  ;;  %v2138_v55 = vld [vmem:[%s2377_s10] sm:$0x3] }
 0x193   :  { %546 = vrot.lane.b32.xlu0 %v2138_v55, %s1812_s27  ;;  %540 = vrot.lane.b32.xlu2 %v2138_v55, %s1813_s0  ;;  %s1817_s27 = smov 104  }
 0x197   :  { %v181_v56 = vpop.f32.mrf.mxu2 }
 0x198   :  { %v182_v57 = vadd.f32 %v1725_v54, %v181_v56  ;;  %v1727_v58 = vpop.eup %1726  ;;  %v1696_v54 = vld [vmem:[%s2376_s9 + $0x1d8] sm:$0xff] }
 0x19a   :  { %1728 = vtanh.f32 %v182_v57 }
 0x19b   :  { %543 = vrot.lane.b32.xlu2 %v2138_v55, %s1814_s4  ;;  %s1818_s4 = smov [#allocation2]  }
 0x1a0   :  { %v1729_v59 = vpop.eup %1728 }
 0x1a1   :  { %v186_v60 = vpack.c.bf16 %v1729_v59, %v1727_v58 }
 0x1a3   :  { %1367 = vmatmul.msk.bf16.vlgmr.msra.gmra.mxu3 %vm113_vm2, %v186_v60  ;;  %1368 = vmatmul.msk.bf16.vlgmr.msrb.gmra.mxu0 %vm113_vm2, %v186_v60  ;;  %v1671_v60 = vld [vmem:[%s2376_s9 + $0x110] sm:$0xff] }
 0x1a4   :  { %1036 = vmatpush.bf16.msra.mxu3 %v1692_v23  ;;  %1050 = vmatpush.bf16.msrb.mxu0 %v1700_v24 }
 0x1a5   :  { %1013 = vmatpush.bf16.msrb.mxu1 %v1671_v60 }
 0x1a8   :  { %1037 = vmatpush.bf16.msra.mxu3 %v1691_v27  ;;  %1051 = vmatpush.bf16.msrb.mxu0 %v1699_v28 }
 0x1a9   :  { %1014 = vmatpush.bf16.msrb.mxu1 %v1670_v16 }
 0x1ac   :  { %1038 = vmatpush.bf16.msra.mxu3 %v1690_v32  ;;  %1052 = vmatpush.bf16.msrb.mxu0 %v1698_v33 }
 0x1ad   :  { %1015 = vmatpush.bf16.msrb.mxu1 %v1669_v36 }
 0x1b0   :  { %1039 = vmatpush.bf16.msra.mxu3 %v1689_v38  ;;  %1053 = vmatpush.bf16.msrb.mxu0 %v1697_v39 }
 0x1b4   :  { %1040 = vmatpush.bf16.msra.mxu3 %v1688_v50  ;;  %1054 = vmatpush.bf16.msrb.mxu0 %v1696_v54 }
 0x1b8   :  { %1041 = vmatpush.bf16.msra.mxu3 %v1687_v2  ;;  %1055 = vmatpush.bf16.msrb.mxu0 %v1695_v3 }
 0x1bc   :  { %1042 = vmatpush.bf16.msra.mxu3 %v1686_v21  ;;  %1056 = vmatpush.bf16.msrb.mxu0 %v1694_v22 }
 0x220   :  { %v243_v34 = vpop.f32.mrf.mxu0 }
 0x221   :  { %v2114_v40 = vadd.f32 %v243_v34, %v194_v35 }
 0x223   :  { %v251_v43 = vrot.slane %v2114_v40, 2  ;;  %v253_v44 = vrot.slane %v2114_v40, 3  ;;  %v255_v45 = vrot.slane %v2114_v40, 4  ;;  %v257_v51 = vrot.slane %v2114_v40, 5 }
 0x224   :  { %v259_v52 = vrot.slane %v2114_v40, 6  ;;  %v249_v53 = vrot.slane %v2114_v40, 1  ;;  %v261_v62 = vrot.slane %v2114_v40, 7 }
 0x226   :  { %v229_v46 = vpop.f32.mrf.mxu3 }
 0x227   :  { %v2178_v23 = vadd.f32 %v229_v46, %v193_v41 }
 0x228   :  { %v245_v42 = vpop.f32.mrf.mxu0 }
 0x229   :  { %v246_v47 = vadd.f32 %v245_v42, %v194_v35  ;;  %v1685_v42 = vld [vmem:[%s2376_s9 + $0x180] sm:$0xff] }
 0x22a   :  { %1043 = vmatpush.bf16.msra.mxu3 %v1685_v42 }
 0x22b   :  { %v270_v56 = vrot.slane %v246_v47, 7  ;;  %v1370_v57 = vrot.slane %v246_v47, 9  ;;  %v1371_v58 = vrot.slane %v246_v47, 10  ;;  %v1372_v59 = vrot.slane %v246_v47, 11 }
 0x22c   :  { %v1373_v63 = vrot.slane %v246_v47, 12  ;;  %v1374_v0 = vrot.slane %v246_v47, 13  ;;  %v288_v1 = vsel %vm286_vm6, %v249_v53, %v246_v47 }
 0x22d   :  { %v277_v4 = vrot.slane %v270_v56, 7  ;;  %v287_v5 = vsel %vm286_vm6, %v2114_v40, %v270_v56  ;;  %v289_v6 = vsel %vm286_vm6, %v251_v43, %v1370_v57  ;;  %v290_v7 = vsel %vm286_vm6, %v253_v44, %v1371_v58  ;;  %v1693_v43 = vld [vmem:[%s2376_s9 + $0x1c0] sm:$0xff] }
 0x22e   :  { %v291_v8 = vsel %vm286_vm6, %v255_v45, %v1372_v59  ;;  %v292_v9 = vsel %vm286_vm6, %v257_v51, %v1373_v63  ;;  %v293_v10 = vsel %vm286_vm6, %v259_v52, %v1374_v0  ;;  %v303_v11 = vrot.slane %v288_v1, 7  ;;  %v231_v34 = vpop.f32.mrf.mxu3  ;;  %1057 = vmatpush.bf16.msrb.mxu0 %v1693_v43 }
 0x22f   :  { %v294_v12 = vsel %vm286_vm6, %v261_v62, %v277_v4  ;;  %v304_v13 = vrot.slane %v289_v6, 6  ;;  %v305_v14 = vrot.slane %v290_v7, 5  ;;  %v306_v15 = vrot.slane %v291_v8, 4 }
 0x230   :  { %v307_v18 = vrot.slane %v292_v9, 3  ;;  %v308_v19 = vrot.slane %v293_v10, 2  ;;  %v309_v20 = vrot.slane %v294_v12, 1  ;;  %v310_v24 = vsel %vm286_vm6, %v287_v5, %v303_v11 }
 0x231   :  { %v312_v25 = vsel %vm311_vm7, %v304_v13, %v305_v14  ;;  %v326_v26 = vsel %vm325_vm12, %v304_v13, %v305_v14  ;;  %v324_v30 = vsel %vm323_vm11, %v287_v5, %v303_v11  ;;  %v232_v49 = vadd.f32 %v231_v34, %v193_v41 }
 0x232   :  { %v314_v27 = vsel %vm313_vm8, %v310_v24, %v312_v25  ;;  %v316_v28 = vsel %vm315_vm9, %v306_v15, %v307_v18  ;;  %v318_v29 = vsel %vm317_vm10, %v308_v19, %v309_v20  ;;  %v330_v32 = vsel %vm329_vm13, %v306_v15, %v307_v18 }
 0x233   :  { %v332_v33 = vsel %vm331_vm14, %v309_v20, %v308_v19  ;;  %v320_v35 = vsel %vm319_vm15, %v316_v28, %v318_v29  ;;  %v328_v38 = vsel %vm327_vm1, %v324_v30, %v326_v26  ;;  %vm550_vm6 = vcmask 130048  }
 0x234   :  { %v334_v39 = vsel %vm333_vm3, %v330_v32, %v332_v33  ;;  %v2199_v40 = vsel %vm321_vm5, %v314_v27, %v320_v35  ;;  %vm552_vm7 = vcmask 195584   ;;  %vm1167_vm8 = vcmask 195712  }
 0x235   :  { %v336_v44 = vsel %vm335_vm4, %v328_v38, %v334_v39  ;;  %v338_v45 = vperm.slane %v2199_v40, 0  ;;  %v339_v46 = vperm.slane %v2199_v40, 1  ;;  %v340_v47 = vperm.slane %v2199_v40, 2 }
 0x236   :  { %v2211_v48 = vrot.slane %v336_v44, 1  ;;  %v341_v53 = vperm.slane %v2199_v40, 3  ;;  %v342_v0 = vperm.slane %v2199_v40, 4  ;;  %v343_v4 = vperm.slane %v2199_v40, 5  ;;  %v547_v44 = vpop.permute.xlu0 %546 }
 0x237   :  { %v370_v50 = vadd.f32 %v338_v45, %v2178_v23  ;;  %v371_v51 = vadd.f32 %v339_v46, %v2178_v23  ;;  %v372_v52 = vadd.f32 %v340_v47, %v2178_v23  ;;  %v344_v15 = vperm.slane %v2199_v40, 6  ;;  %v560_v47 = vld [vmem:[%s2378_s11] sm:$0xff] }
 0x238   :  { %v346_v54 = vperm.slane %v2211_v48, 0  ;;  %v347_v56 = vperm.slane %v2211_v48, 1  ;;  %v348_v31 = vperm.slane %v2211_v48, 2  ;;  %v349_v41 = vperm.slane %v2211_v48, 3 }
 0x239   :  { %1730 = vtanh.f32 %v370_v50  ;;  %v373_v60 = vadd.f32 %v341_v53, %v2178_v23  ;;  %v350_v2 = vperm.slane %v2211_v48, 4  ;;  %v351_v7 = vperm.slane %v2211_v48, 5 }
 0x23a   :  { %v378_v57 = vadd.f32 %v346_v54, %v232_v49  ;;  %v379_v58 = vadd.f32 %v347_v56, %v232_v49  ;;  %1732 = vtanh.f32 %v371_v51  ;;  %v380_v59 = vadd.f32 %v348_v31, %v232_v49 }
 0x23b   :  { %1734 = vtanh.f32 %v372_v52  ;;  %v381_v61 = vadd.f32 %v349_v41, %v232_v49  ;;  %v374_v10 = vadd.f32 %v342_v0, %v2178_v23  ;;  %v352_v11 = vperm.slane %v2211_v48, 6 }
 0x23c   :  { %1736 = vtanh.f32 %v378_v57  ;;  %v382_v14 = vadd.f32 %v350_v2, %v232_v49  ;;  %v375_v17 = vadd.f32 %v343_v4, %v2178_v23  ;;  %v353_v18 = vperm.slane %v2211_v48, 7 }
 0x23d   :  { %1738 = vtanh.f32 %v379_v58  ;;  %v383_v20 = vadd.f32 %v351_v7, %v232_v49  ;;  %v384_v21 = vadd.f32 %v352_v11, %v232_v49  ;;  %v345_v22 = vperm.slane %v2199_v40, 7 }
 0x23e   :  { %1740 = vtanh.f32 %v380_v59  ;;  %v376_v24 = vadd.f32 %v344_v15, %v2178_v23  ;;  %v385_v25 = vadd.f32 %v353_v18, %v232_v49  ;;  %vm1109_vm9 = vcmask 130112  }
 0x23f   :  { %v1731_v62 = vpop.eup %1730  ;;  %1742 = vtanh.f32 %v373_v60  ;;  %v377_v26 = vadd.f32 %v345_v22, %v2178_v23  ;;  %v541_v23 = vpop.permute.xlu2 %540  ;;  %vm1225_vm10 = vcmask 261312  }
 0x240   :  { %v1733_v63 = vpop.eup %1732  ;;  %1744 = vtanh.f32 %v381_v61  ;;  %v549_v40 = vsel %vm83_vm0, %v2138_v55, %v541_v23  ;;  %v561_v55 = vld [vmem:[%s2378_s11 + $0x8] sm:$0xff] }
 0x241   :  { %v1735_v1 = vpop.eup %1734  ;;  %1746 = vtanh.f32 %v374_v10 }
 0x242   :  { %v1737_v3 = vpop.eup %1736  ;;  %1748 = vtanh.f32 %v382_v14 }
 0x243   :  { %v1739_v5 = vpop.eup %1738  ;;  %v402_v6 = vpack.c.bf16 %v1737_v3, %v1731_v62  ;;  %1750 = vtanh.f32 %v375_v17 }
 0x244   :  { %v1741_v8 = vpop.eup %1740  ;;  %v403_v9 = vpack.c.bf16 %v1739_v5, %v1733_v63  ;;  %1752 = vtanh.f32 %v383_v20 }
 0x245   :  { %v1743_v12 = vpop.eup %1742  ;;  %960 = vmatmul.bf16.vlgmr.msra.gmra.mxu1 %v402_v6  ;;  %v404_v13 = vpack.c.bf16 %v1741_v8, %v1735_v1  ;;  %1754 = vtanh.f32 %v384_v21 }
 0x246   :  { %v1745_v16 = vpop.eup %1744  ;;  %974 = vmatmul.bf16.vlgmr.msrb.gmra.mxu2 %v403_v9  ;;  %1756 = vtanh.f32 %v376_v24 }
 0x247   :  { %988 = vmatmul.bf16.vlgmr.msrb.gmra.mxu3 %v404_v13  ;;  %v405_v19 = vpack.c.bf16 %v1745_v16, %v1743_v12  ;;  %v1747_v27 = vpop.eup %1746  ;;  %1758 = vtanh.f32 %v385_v25  ;;  %v544_v42 = vpop.permute.xlu2 %543 }
 0x248   :  { %v1749_v28 = vpop.eup %1748  ;;  %1760 = vtanh.f32 %v377_v26  ;;  %v551_v43 = vsel %vm550_vm6, %v549_v40, %v544_v42 }
 0x249   :  { %1002 = vmatmul.bf16.vlgmr.msra.gmra.mxu0 %v405_v19  ;;  %v1751_v29 = vpop.eup %1750  ;;  %v406_v34 = vpack.c.bf16 %v1749_v28, %v1747_v27  ;;  %v553_v45 = vsel %vm552_vm7, %v551_v43, %v547_v44 }
 0x24a   :  { %v1753_v30 = vpop.eup %1752  ;;  %v556_v46 = vperm.slane %v553_v45, 0  ;;  %v555_v48 = vrot.slane %v553_v45, 1 }
 0x24b   :  { %v1755_v32 = vpop.eup %1754  ;;  %v407_v36 = vpack.c.bf16 %v1753_v30, %v1751_v29 }
 0x24c   :  { %v1757_v33 = vpop.eup %1756  ;;  %v562_v49 = vmul.f32 %v560_v47, %v556_v46  ;;  %v557_v51 = vperm.slane %v555_v48, 0 }
 0x24d   :  { %v1759_v35 = vpop.eup %1758  ;;  %v408_v37 = vpack.c.bf16 %v1755_v32, %v1757_v33 }
 0x24e   :  { %v1761_v38 = vpop.eup %1760  ;;  %v564_v52 = vsub.f32 1.0, %v562_v49  ;;  %v563_v56 = vmul.f32 %v561_v55, %v557_v51 }
 0x24f   :  { %v409_v39 = vpack.c.bf16 %v1759_v35, %v1761_v38 }
 0x250   :  { %v566_v54 = vmul.f32 -1024.0, %v564_v52  ;;  %v565_v59 = vsub.f32 1.0, %v563_v56 }
 0x252   :  { %v567_v61 = vmul.f32 -1024.0, %v565_v59 }
 0x255   :  { %1016 = vmatmul.bf16.vlgmr.msrb.gmra.mxu1 %v406_v34 }
 0x256   :  { %1030 = vmatmul.bf16.vlgmr.msra.gmra.mxu2 %v407_v36 }
 0x257   :  { %1044 = vmatmul.bf16.vlgmr.msra.gmra.mxu3 %v408_v37 }
 0x259   :  { %1058 = vmatmul.bf16.vlgmr.msrb.gmra.mxu0 %v409_v39 }
 0x2c2   :  { %v961_v50 = vpop.f32.mrf.mxu1 }
 0x2c3   :  { %v962_v58 = vadd.f32 %v961_v50, %v566_v54 }
 0x2c6   :  { %v1003_v53 = vpop.f32.mrf.mxu0 }
 0x2c9   :  { %v975_v31 = vpop.f32.mrf.mxu2 }
 0x2ca   :  { %v989_v41 = vpop.f32.mrf.mxu3  ;;  %v963_v57 = vpop.f32.mrf.mxu1  ;;  %v976_v60 = vadd.f32 %v975_v31, %v962_v58 }
 0x2cb   :  { %v964_v3 = vadd.f32 %v963_v57, %v567_v61 }
 0x2cc   :  { %v990_v0 = vadd.f32 %v989_v41, %v976_v60 }
 0x2ce   :  { %v1005_v62 = vpop.f32.mrf.mxu0  ;;  %v1004_v5 = vadd.f32 %v1003_v53, %v990_v0 }
 0x2d1   :  { %v977_v63 = vpop.f32.mrf.mxu2 }
 0x2d2   :  { %v991_v1 = vpop.f32.mrf.mxu3  ;;  %v1017_v2 = vpop.f32.mrf.mxu1  ;;  %v978_v4 = vadd.f32 %v977_v63, %v964_v3 }
 0x2d3   :  { %v1018_v6 = vadd.f32 %v1017_v2, %v1004_v5 }
 0x2d4   :  { %v992_v8 = vadd.f32 %v991_v1, %v978_v4 }
 0x2d6   :  { %v1059_v11 = vpop.f32.mrf.mxu0  ;;  %v1006_v15 = vadd.f32 %v1005_v62, %v992_v8 }
 0x2d9   :  { %v1031_v7 = vpop.f32.mrf.mxu2 }
 0x2da   :  { %v1032_v9 = vadd.f32 %v1031_v7, %v1018_v6  ;;  %v1045_v10 = vpop.f32.mrf.mxu3  ;;  %v1019_v13 = vpop.f32.mrf.mxu1 }
 0x2db   :  { %v1020_v16 = vadd.f32 %v1019_v13, %v1006_v15 }
 0x2dc   :  { %v1046_v12 = vadd.f32 %v1045_v10, %v1032_v9 }
 0x2de   :  { %v2245_v14 = vadd.f32 %v1059_v11, %v1046_v12  ;;  %v1061_v24 = vpop.f32.mrf.mxu0 }
 0x2e0   :  { %1064 = vst.msk [vmem:[%s2380_s13] sm:$0xff] %vm113_vm2, %v2245_v14  ;;  %v1168_v17 = vsel %vm1167_vm8, %v2245_v14, -inf  ;;  %v1110_v18 = vsel %vm1109_vm9, %v2245_v14, -inf  ;;  %v1226_v26 = vsel %vm1225_vm10, %v2245_v14, -inf  ;;  %v1068_v54 = vsel %vm83_vm0, %v2245_v14, -inf }
 0x2e1   :  { %v1033_v19 = vpop.f32.mrf.mxu2  ;;  %1169 = vmax.xlane.f32.xlu0 %v1168_v17  ;;  %1111 = vmax.xlane.f32.xlu1 %v1110_v18  ;;  %v2323_v18 = vld [vmem:[%s2379_s12] sm:$0xff] }
 0x2e2   :  { %v1034_v20 = vadd.f32 %v1033_v19, %v1020_v16  ;;  %v1047_v21 = vpop.f32.mrf.mxu3 }
 0x2e4   :  { %v1048_v22 = vadd.f32 %v1047_v21, %v1034_v20 }
 0x2e6   :  { %v2256_v25 = vadd.f32 %v1061_v24, %v1048_v22 }
 0x2e8   :  { %1065 = vst.msk [vmem:[%s2380_s13 + $0x8] sm:$0xff] %vm113_vm2, %v2256_v25  ;;  %v1113_v27 = vsel %vm1109_vm9, %v2256_v25, -inf  ;;  %v1171_v28 = vsel %vm1167_vm8, %v2256_v25, -inf  ;;  %v1229_v29 = vsel %vm1225_vm10, %v2256_v25, -inf  ;;  %s1815_s13 = smov 112   ;;  %v1071_v56 = vsel %vm83_vm0, %v2256_v25, -inf }
 0x2e9   :  { %1227 = vmax.xlane.f32.xlu1 %v1226_v26  ;;  %1114 = vmax.xlane.f32.xlu2 %v1113_v27 }
 0x2f1   :  { %1172 = vmax.xlane.f32.xlu2 %v1171_v28 }
 0x2f9   :  { %1230 = vmax.xlane.f32.xlu2 %v1229_v29 }
 0x354   :  { %v2269_v30 = vpop.xlane.xlu0 %1169  ;;  %v2271_v32 = vpop.xlane.xlu1 %1111 }
 0x355   :  { %v1174_v33 = vsub.f32 %v2245_v14, %v2269_v30  ;;  %v1116_v34 = vsub.f32 %v2245_v14, %v2271_v32 }
 0x357   :  { %v1176_v35 = vmul.f32 1.442695, %v1174_v33  ;;  %v1118_v36 = vmul.f32 1.442695, %v1116_v34 }
 0x359   :  { %1762 = vpow2.f32 %v1176_v35 }
 0x35a   :  { %1764 = vpow2.f32 %v1118_v36 }
 0x35c   :  { %v2277_v37 = vpop.xlane.xlu1 %1227  ;;  %v2279_v38 = vpop.xlane.xlu2 %1114 }
 0x35d   :  { %v1232_v39 = vsub.f32 %v2245_v14, %v2277_v37  ;;  %v1117_v43 = vsub.f32 %v2256_v25, %v2279_v38 }
 0x35f   :  { %v1763_v23 = vpop.eup %1762  ;;  %v1234_v40 = vmul.f32 1.442695, %v1232_v39  ;;  %v1120_v44 = vmul.f32 1.442695, %v1117_v43 }
 0x360   :  { %v1765_v42 = vpop.eup %1764  ;;  %1182 = vrot.lane.b32.xlu2 %v1763_v23, %s1815_s13 }
 0x361   :  { %1766 = vpow2.f32 %v1234_v40  ;;  %1124 = vrot.lane.b32.xlu0 %v1765_v42, %s1816_s1 }
 0x362   :  { %1768 = vpow2.f32 %v1120_v44 }
 0x364   :  { %v2287_v45 = vpop.xlane.xlu2 %1172 }
 0x365   :  { %v1175_v46 = vsub.f32 %v2256_v25, %v2287_v45 }
 0x367   :  { %v1767_v47 = vpop.eup %1766  ;;  %v1178_v48 = vmul.f32 1.442695, %v1175_v46 }
 0x368   :  { %1240 = vrot.lane.b32.xlu1 %v1767_v47, %s1817_s27  ;;  %v1769_v51 = vpop.eup %1768  ;;  %v1067_v47 = vld [vmem:[%s2379_s12 + $0x8] sm:$0xff] }
 0x369   :  { %1770 = vpow2.f32 %v1178_v48 }
 0x36c   :  { %v2292_v49 = vpop.xlane.xlu2 %1230 }
 0x36d   :  { %v1233_v50 = vsub.f32 %v2256_v25, %v2292_v49 }
 0x36f   :  { %v1771_v52 = vpop.eup %1770  ;;  %v1236_v55 = vmul.f32 1.442695, %v1233_v50 }
 0x370   :  { %1126 = vrot.lane.b32.xlu1 %v1769_v51, %s1816_s1  ;;  %1184 = vrot.lane.b32.xlu0 %v1771_v52, %s1815_s13 }
 0x371   :  { %1772 = vpow2.f32 %v1236_v55 }
 0x377   :  { %v1773_v53 = vpop.eup %1772 }
 0x378   :  { %1242 = vrot.lane.b32.xlu0 %v1773_v53, %s1817_s27 }
 0x389   :  { %1069 = vmax.xlane.f32.xlu2 %v1068_v54 }
 0x39a   :  { %1072 = vmax.xlane.f32.xlu1 %v1071_v56 }
 0x3ba   :  { %v1183_v31 = vpop.permute.xlu2 %1182 }
 0x3bb   :  { %v1188_v41 = vsel %vm83_vm0, %v1183_v31, 0.0 }
 0x3bc   :  { %1189 = vadd.xlane.f32.xlu1 %v1188_v41 }
 0x3d3   :  { %v1125_v57 = vpop.permute.xlu0 %1124 }
 0x3d4   :  { %v1130_v58 = vsel %vm83_vm0, %v1125_v57, 0.0 }
 0x3d5   :  { %1131 = vadd.xlane.f32.xlu0 %v1130_v58 }
 0x3da   :  { %v1241_v59 = vpop.permute.xlu1 %1240 }
 0x3db   :  { %v1246_v60 = vsel %vm83_vm0, %v1241_v59, 0.0 }
 0x3dc   :  { %1247 = vadd.xlane.f32.xlu2 %v1246_v60 }
 0x3e2   :  { %v1127_v61 = vpop.permute.xlu1 %1126  ;;  %v1185_v62 = vpop.permute.xlu0 %1184 }
 0x3e3   :  { %v1133_v63 = vsel %vm83_vm0, %v1127_v61, 0.0  ;;  %v1191_v0 = vsel %vm83_vm0, %v1185_v62, 0.0 }
 0x3e4   :  { %1134 = vadd.xlane.f32.xlu2 %v1133_v63  ;;  %1192 = vadd.xlane.f32.xlu0 %v1191_v0 }
 0x3ea   :  { %v1243_v1 = vpop.permute.xlu0 %1242 }
 0x3eb   :  { %v1249_v2 = vsel %vm83_vm0, %v1243_v1, 0.0 }
 0x3ec   :  { %1250 = vadd.xlane.f32.xlu1 %v1249_v2 }
 0x3fc   :  { %v2309_v3 = vpop.xlane.xlu2 %1069 }
 0x3fd   :  { %v1074_v4 = vsub.f32 %v2245_v14, %v2309_v3 }
 0x3ff   :  { %v1076_v5 = vmul.f32 1.442695, %v1074_v4 }
 0x401   :  { %1774 = vpow2.f32 %v1076_v5 }
 0x407   :  { %v1775_v6 = vpop.eup %1774 }
 0x408   :  { %v1080_v7 = vsel %vm83_vm0, %v1775_v6, 0.0 }
 0x409   :  { %1081 = vadd.xlane.f32.xlu0 %v1080_v7 }
 0x40d   :  { %v2314_v8 = vpop.xlane.xlu1 %1072 }
 0x40e   :  { %v1075_v9 = vsub.f32 %v2256_v25, %v2314_v8 }
 0x410   :  { %v1078_v10 = vmul.f32 1.442695, %v1075_v9 }
 0x412   :  { %1776 = vpow2.f32 %v1078_v10 }
 0x418   :  { %v1777_v11 = vpop.eup %1776 }
 0x419   :  { %v1083_v12 = vsel %vm83_vm0, %v1777_v11, 0.0 }
 0x41a   :  { %1084 = vadd.xlane.f32.xlu2 %v1083_v12 }
 0x42f   :  { %v1190_v13 = vpop.xlane.xlu1 %1189 }
 0x430   :  { %1778 = vlog2.f32 %v1190_v13  ;;  %v1283_v13 = vsel %vm113_vm2, %v2323_v18, 0.0 }
 0x436   :  { %v1779_v15 = vpop.eup %1778 }
 0x437   :  { %v1195_v16 = vmul.f32 0.6931472, %v1779_v15  ;;  %v1284_v15 = vsel %vm113_vm2, %v1067_v47, 0.0 }
 0x439   :  { %v1198_v17 = vadd.f32 %v1195_v16, %v2269_v30 }
 0x43b   :  { %v1200_v19 = vsub.f32 %v1198_v17, %v2245_v14  ;;  %v1285_v17 = vadd.f32 %v1284_v15, %v1283_v13 }
 0x43d   :  { %v1202_v20 = vmul.f32 %v1200_v19, %v2323_v18 }
 0x43f   :  { %1206 = vrot.lane.b32.xlu2 %v1202_v20, %s1815_s13 }
 0x448   :  { %v1132_v21 = vpop.xlane.xlu0 %1131 }
 0x449   :  { %1780 = vlog2.f32 %v1132_v21 }
 0x44f   :  { %v1781_v22 = vpop.eup %1780  ;;  %v1248_v24 = vpop.xlane.xlu2 %1247 }
 0x450   :  { %v1137_v26 = vmul.f32 0.6931472, %v1781_v22  ;;  %1782 = vlog2.f32 %v1248_v24 }
 0x452   :  { %v1140_v27 = vadd.f32 %v1137_v26, %v2271_v32 }
 0x454   :  { %v1142_v28 = vsub.f32 %v1140_v27, %v2245_v14 }
 0x456   :  { %v1783_v29 = vpop.eup %1782  ;;  %v1144_v30 = vmul.f32 %v1142_v28, %v2323_v18 }
 0x457   :  { %v1253_v33 = vmul.f32 0.6931472, %v1783_v29  ;;  %v1193_v34 = vpop.xlane.xlu0 %1192  ;;  %v1135_v35 = vpop.xlane.xlu2 %1134 }
 0x458   :  { %1784 = vlog2.f32 %v1193_v34  ;;  %1148 = vrot.lane.b32.xlu1 %v1144_v30, %s1816_s1 }
 0x459   :  { %v1256_v36 = vadd.f32 %v1253_v33, %v2277_v37  ;;  %1786 = vlog2.f32 %v1135_v35 }
 0x45b   :  { %v1258_v39 = vsub.f32 %v1256_v36, %v2245_v14 }
 0x45d   :  { %v1260_v23 = vmul.f32 %v1258_v39, %v2323_v18 }
 0x45e   :  { %v1785_v40 = vpop.eup %1784 }
 0x45f   :  { %v1787_v32 = vpop.eup %1786  ;;  %v1251_v42 = vpop.xlane.xlu1 %1250  ;;  %v1197_v44 = vmul.f32 0.6931472, %v1785_v40 }
 0x460   :  { %v1139_v43 = vmul.f32 0.6931472, %v1787_v32  ;;  %1264 = vrot.lane.b32.xlu1 %v1260_v23, %s1817_s27  ;;  %1788 = vlog2.f32 %v1251_v42 }
 0x461   :  { %v1199_v50 = vadd.f32 %v1197_v44, %v2287_v45 }
 0x462   :  { %v1141_v46 = vadd.f32 %v1139_v43, %v2279_v38 }
 0x463   :  { %v1201_v53 = vsub.f32 %v1199_v50, %v2256_v25 }
 0x464   :  { %v1143_v37 = vsub.f32 %v1141_v46, %v2256_v25 }
 0x465   :  { %v1203_v56 = vmul.f32 %v1201_v53, %v1067_v47 }
 0x466   :  { %v1789_v48 = vpop.eup %1788  ;;  %v1145_v51 = vmul.f32 %v1143_v37, %v1067_v47 }
 0x467   :  { %v1255_v52 = vmul.f32 0.6931472, %v1789_v48 }
 0x468   :  { %1150 = vrot.lane.b32.xlu0 %v1145_v51, %s1816_s1 }
 0x469   :  { %v1257_v55 = vadd.f32 %v1255_v52, %v2292_v49 }
 0x46b   :  { %v1259_v54 = vsub.f32 %v1257_v55, %v2256_v25 }
 0x46d   :  { %v1261_v38 = vmul.f32 %v1259_v54, %v1067_v47 }
 0x46f   :  { %1266 = vrot.lane.b32.xlu2 %v1261_v38, %s1817_s27 }
 0x470   :  { %1208 = vrot.lane.b32.xlu0 %v1203_v56, %s1815_s13 }
 0x47c   :  { %v1082_v31 = vpop.xlane.xlu0 %1081 }
 0x47d   :  { %1790 = vlog2.f32 %v1082_v31 }
 0x483   :  { %v1791_v41 = vpop.eup %1790 }
 0x484   :  { %v1087_v45 = vmul.f32 0.6931472, %v1791_v41 }
 0x486   :  { %v1090_v58 = vadd.f32 %v1087_v45, %v2309_v3 }
 0x488   :  { %v1092_v49 = vsub.f32 %v1090_v58, %v2245_v14 }
 0x48a   :  { %v1094_v63 = vmul.f32 %v1092_v49, %v2323_v18 }
 0x48c   :  { %v1096_v1 = vsel %vm83_vm0, %v1094_v63, 0.0 }
 0x48d   :  { %v1085_v57 = vpop.xlane.xlu2 %1084 }
 0x48e   :  { %1792 = vlog2.f32 %v1085_v57 }
 0x494   :  { %v1793_v59 = vpop.eup %1792 }
 0x495   :  { %v1089_v60 = vmul.f32 0.6931472, %v1793_v59 }
 0x497   :  { %v1091_v61 = vadd.f32 %v1089_v60, %v2314_v8 }
 0x499   :  { %v1093_v62 = vsub.f32 %v1091_v61, %v2256_v25  ;;  %v1207_v5 = vpop.permute.xlu2 %1206 }
 0x49a   :  { %v1212_v19 = vsel %vm83_vm0, %v1207_v5, 0.0 }
 0x49b   :  { %v1095_v0 = vmul.f32 %v1093_v62, %v1067_v47 }
 0x49d   :  { %v1097_v2 = vsel %vm83_vm0, %v1095_v0, 0.0 }
 0x49e   :  { %v1098_v4 = vadd.f32 %v1097_v2, %v1096_v1 }
 0x4a0   :  { %1099 = vadd.xlane.f32.xlu0 %v1098_v4 }
 0x4c9   :  { %v1267_v3 = vpop.permute.xlu2 %1266 }
 0x4ca   :  { %v1149_v6 = vpop.permute.xlu1 %1148  ;;  %v1271_v14 = vsel %vm83_vm0, %v1267_v3, 0.0 }
 0x4cb   :  { %v1154_v10 = vsel %vm83_vm0, %v1149_v6, 0.0 }
 0x4d2   :  { %v1265_v7 = vpop.permute.xlu1 %1264 }
 0x4d3   :  { %v1270_v9 = vsel %vm83_vm0, %v1265_v7, 0.0 }
 0x4d4   :  { %v1272_v8 = vadd.f32 %v1271_v14, %v1270_v9 }
 0x4d6   :  { %1273 = vadd.xlane.f32.xlu0 %v1272_v8 }
 0x4da   :  { %v1151_v25 = vpop.permute.xlu0 %1150 }
 0x4db   :  { %v1155_v11 = vsel %vm83_vm0, %v1151_v25, 0.0 }
 0x4dc   :  { %v1156_v12 = vadd.f32 %v1155_v11, %v1154_v10 }
 0x4de   :  { %1157 = vadd.xlane.f32.xlu1 %v1156_v12 }
 0x4e2   :  { %v1209_v16 = vpop.permute.xlu0 %1208 }
 0x4e3   :  { %v1213_v20 = vsel %vm83_vm0, %v1209_v16, 0.0 }
 0x4e4   :  { %v1214_v21 = vadd.f32 %v1213_v20, %v1212_v19 }
 0x4e6   :  { %1215 = vadd.xlane.f32.xlu2 %v1214_v21  ;;  %1286 = vadd.xlane.f32.xlu1 %v1285_v17 }
 0x513   :  { %v1100_v22 = vpop.xlane.xlu0 %1099 }
 0x514   :  { %v1101_v24 = vrot.slane %v1100_v22, 4 }
 0x516   :  { %v1102_v26 = vadd.f32 %v1101_v24, %v1100_v22 }
 0x518   :  { %v1103_v27 = vrot.slane %v1102_v26, 2 }
 0x51a   :  { %v1104_v28 = vadd.f32 %v1103_v27, %v1102_v26 }
 0x51c   :  { %v1105_v29 = vrot.slane %v1104_v28, 1 }
 0x51e   :  { %v1106_v30 = vadd.f32 %v1105_v29, %v1104_v28 }
 0x520   :  { %1702 = vpush %v1106_v30 }
 0x549   :  { %v1274_v18 = vpop.xlane.xlu0 %1273 }
 0x54a   :  { %v1275_v33 = vrot.slane %v1274_v18, 4 }
 0x54c   :  { %v1276_v39 = vadd.f32 %v1275_v33, %v1274_v18 }
 0x54e   :  { %v1277_v32 = vrot.slane %v1276_v39, 2 }
 0x550   :  { %v1278_v51 = vadd.f32 %v1277_v32, %v1276_v39 }
 0x551   :  { %v1158_v34 = vpop.xlane.xlu1 %1157  ;;  %s1703_s12 = spop %1702 }
 0x552   :  { %v1159_v35 = vrot.slane %v1158_v34, 4  ;;  %v1279_v38 = vrot.slane %v1278_v51, 1 }
 0x554   :  { %v1160_v36 = vadd.f32 %v1159_v35, %v1158_v34  ;;  %v1280_v57 = vadd.f32 %v1279_v38, %v1278_v51 }
 0x556   :  { %v1161_v23 = vrot.slane %v1160_v36, 2 }
 0x558   :  { %v1162_v40 = vadd.f32 %v1161_v23, %v1160_v36 }
 0x559   :  { %v1216_v42 = vpop.xlane.xlu2 %1215  ;;  %v1287_v43 = vpop.xlane.xlu1 %1286 }
 0x55a   :  { %v1217_v44 = vrot.slane %v1216_v42, 4  ;;  %v1288_v46 = vrot.slane %v1287_v43, 4  ;;  %v1163_v47 = vrot.slane %v1162_v40, 1 }
 0x55c   :  { %v1218_v37 = vadd.f32 %v1217_v44, %v1216_v42  ;;  %v1289_v48 = vadd.f32 %v1288_v46, %v1287_v43  ;;  %v1164_v50 = vadd.f32 %v1163_v47, %v1162_v40 }
 0x55e   :  { %v1219_v52 = vrot.slane %v1218_v37, 2  ;;  %v1290_v55 = vrot.slane %v1289_v48, 2  ;;  %1704 = vpush %v1164_v50 }
 0x560   :  { %v1220_v53 = vadd.f32 %v1219_v52, %v1218_v37  ;;  %v1291_v54 = vadd.f32 %v1290_v55, %v1289_v48 }
 0x562   :  { %v1221_v56 = vrot.slane %v1220_v53, 1  ;;  %v1292_v31 = vrot.slane %v1291_v54, 1 }
 0x564   :  { %v1222_v41 = vadd.f32 %v1221_v56, %v1220_v53  ;;  %v1293_v45 = vadd.f32 %v1292_v31, %v1291_v54 }
 0x566   :  { %1706 = vpush %v1222_v41 }
 0x567   :  { %1708 = vpush %v1280_v57 }
 0x568   :  { %1710 = vpush %v1293_v45 }
 0x58f   :  { %s1705_s2 = spop %1704 }
 0x590   :  { %s1166_s3 = sadd.f32 %s1705_s2, %s1703_s12 }
 0x597   :  { %s1707_s29 = spop %1706 }
 0x598   :  { %s1224_s30 = sadd.f32 %s1707_s29, %s1166_s3  ;;  %s1709_s15 = spop %1708 }
 0x599   :  { %s1711_s16 = spop %1710 }
 0x59a   :  { %s1282_s17 = sadd.f32 %s1709_s15, %s1224_s30 }
 0x59b   :  { %s1295_s7 = sadd.f32 1e-06, %s1711_s16 }
 0x59d   :  { %v1296_v58 = vstv %s1295_s7 }
 0x59e   :  { %1794 = vrcp.f32 %v1296_v58  ;;  %v1308_v61 = vand.u32 2147483648, %v1296_v58  ;;  %v1306_v63 = vand.u32 2147483647, %v1296_v58  ;;  %vm1302_vm2 = vweird.f32 %v1296_v58 }
 0x5a0   :  { %v1309_v1 = vor.u32 1.1754944e-38, %v1308_v61  ;;  %vm1307_vm12 = vcmp.eq.f32.partialorder %v1306_v63, 8.507059e+37 }
 0x5a4   :  { %v1795_v59 = vpop.eup %1794 }
 0x5a5   :  { %v1298_v49 = vmul.f32 %v1795_v59, %v1296_v58  ;;  %vm1303_vm0 = vweird.f32 %v1795_v59 }
 0x5a6   :  { %vm1304_vm11 = vmor %vm1302_vm2, %vm1303_vm0 }
 0x5a7   :  { %v1299_v60 = vsub.f32 1.0, %v1298_v49 }
 0x5a9   :  { %v1300_v62 = vmul.f32 %v1795_v59, %v1299_v60 }
 0x5ab   :  { %v1301_v0 = vadd.f32 %v1795_v59, %v1300_v62 }
 0x5ad   :  { %v1305_v2 = vsel %vm1304_vm11, %v1795_v59, %v1301_v0 }
 0x5ae   :  { %v1310_v4 = vsel %vm1307_vm12, %v1309_v1, %v1305_v2 }
 0x5af   :  { %1712 = vpush %v1310_v4 }
 0x5e0   :  { %s1713_s20 = spop %1712 }
 0x5e1   :  { %s1312_s21 = smul.f32 %s1713_s20, %s1282_s17 }
 0x5e3   :  { %1314 = sst [smem:[#allocation2]] %s1312_s21 }
 0x5e4   :  { %1325 = dma.smem_to_hbm %s1818_s4, 16, %s1323_s19, [#allocation3]  }
 0x5e5   :  { %1808 = dma.done.wait [#allocation3], 16  }
 0x5e6   :  { %1809 = vsyncadd [#allocation3], 4294967280 }
 0x5e7   :  { %1332 = sfence }
 0x5e8   :  { %1333 = vsyncpa [#allocation3], 1 }

</bundles_post_ra>
